<compile_context>
chip_gen: v5e
topology: v5e:2x2
jax: 0.10.0
libtpu: 0.0.40
codegen_flags: <defaults>
</compile_context>

<pallas_src>
import jax
import jax.numpy as jnp
from jax import lax
from jax.experimental import pallas as pl
from jax.experimental.pallas import tpu as pltpu


def _round_up(x, m):
    return ((x + m - 1) // m) * m


def _cdiv(a, b):
    return -(-a // b)


def _linear_kernel(x_ref, w_ref, b_ref, o_ref):
    # x_ref: [tm, in_dim]   caller dtype (f32/bf16); cast to bf16 here (VPU, free
    #                       under MXU/DMA slack) instead of a separate XLA pass.
    # w_ref: [in_dim, N_pad] bf16, pre-transposed once in the wrapper ([K, N]).
    # b_ref: [1, N_pad]      f32
    # o_ref: [tm, N_pad]     caller dtype
    xb = x_ref[...].astype(jnp.bfloat16)
    acc = jnp.dot(xb, w_ref[...], preferred_element_type=jnp.float32)
    o_ref[...] = (acc + b_ref[...]).astype(o_ref.dtype)


def logistic_regression_forward(x, weight, bias):
    """Pallas implementation of LogisticRegressionModel.forward.

    x:      [B, ...] (flattened to [B, in_dim], like x.view(B, -1))
    weight: [out_dim, in_dim]  (PyTorch nn.Linear convention)
    bias:   [out_dim]
    returns [B, out_dim] in x's dtype.
    """
    B = x.shape[0]
    x_flat = x.reshape(B, -1)
    in_dim = x_flat.shape[1]
    out_dim = weight.shape[0]
    assert weight.shape == (out_dim, in_dim)
    out_dtype = x_flat.dtype

    # Lane-dense output width (multiple of 128) -> unmasked full-vreg stores.
    N_pad = _round_up(max(out_dim, 128), 128)

    # ---- batch tile ----------------------------------------------------------
    SUB = 16
    # Cap the (double-buffered) x tile at ~4 MiB so everything fits comfortably
    # inside even v5e's 16 MiB default scoped VMEM.
    x_bytes_per_row = in_dim * x_flat.dtype.itemsize
    tm_vmem_cap = max(SUB, ((4 << 20) // max(x_bytes_per_row, 1)) // SUB * SUB)
    if B <= 2 * SUB:
        tm = _round_up(B, 8)                      # single small tile
    else:
        # >= 2 grid steps so v7x's two TensorCores both receive work; tile grows
        # with B up to 1024 rows (mem-bound regime prefers big tiles).
        tm = min(1024, _round_up(_cdiv(B, 2), SUB))
    tm = min(tm, tm_vmem_cap)
    grid_m = _cdiv(B, tm)

    # ---- grid-invariant operands (one-time, tiny) ----------------------------
    w_t = weight.astype(jnp.bfloat16).T           # [in_dim, out_dim], MXU [K, N]
    if N_pad != out_dim:
        w_t = jnp.pad(w_t, ((0, 0), (0, N_pad - out_dim)))
    b2 = jnp.pad(bias.astype(jnp.float32), (0, N_pad - out_dim)).reshape(1, N_pad)

    # ---- cost / VMEM bookkeeping ---------------------------------------------
    out_itemsize = jnp.dtype(out_dtype).itemsize
    flops = 2 * B * in_dim * N_pad
    bytes_accessed = (x_flat.size * x_flat.dtype.itemsize
                      + w_t.size * 2 + b2.size * 4
                      + B * N_pad * out_itemsize)
    vmem_estimate = (2 * tm * in_dim * x_flat.dtype.itemsize   # x double-buffer
                     + 2 * tm * N_pad * out_itemsize           # out double-buffer
                     + in_dim * N_pad * 2                      # resident bf16 weight
                     + N_pad * 4)                              # bias
    vmem_limit = int(min(max(2 * vmem_estimate, 16 << 20), 32 << 20))

    out = pl.pallas_call(
        _linear_kernel,
        out_shape=jax.ShapeDtypeStruct((B, N_pad), out_dtype),
        grid=(grid_m,),
        in_specs=[
            pl.BlockSpec((tm, in_dim), lambda i: (i, 0)),
            pl.BlockSpec((in_dim, N_pad), lambda i: (0, 0)),
            pl.BlockSpec((1, N_pad), lambda i: (0, 0)),
        ],
        out_specs=pl.BlockSpec((tm, N_pad), lambda i: (i, 0)),
        compiler_params=pltpu.CompilerParams(
            dimension_semantics=("parallel",),
            vmem_limit_bytes=vmem_limit,
        ),
        cost_estimate=pl.CostEstimate(
            flops=flops, transcendentals=0, bytes_accessed=bytes_accessed),
    )(x_flat, w_t, b2)

    return out[:, :out_dim]


if __name__ == "__main__":
    # Small shapes consistent with the module: batch=8, C=1, H=W=16
    # -> in_dim = 256, out_dim = 10 (logistic regression over 10 classes).
    B, C, H, W = 8, 1, 16, 16
    in_dim = C * H * W
    out_dim = 10

    key = jax.random.PRNGKey(0)
    kx, kw, kb, kx2 = jax.random.split(key, 4)

    x = jax.random.normal(kx, (B, C, H, W), dtype=jnp.float32)

    # Deterministic init matching nn.Linear default: U(-1/sqrt(in_dim), 1/sqrt(in_dim))
    bound = 1.0 / (in_dim ** 0.5)
    weight = jax.random.uniform(kw, (out_dim, in_dim), dtype=jnp.float32,
                                minval=-bound, maxval=bound)
    bias = jax.random.uniform(kb, (out_dim,), dtype=jnp.float32,
                              minval=-bound, maxval=bound)

    out = logistic_regression_forward(x, weight, bias)
    out = jax.block_until_ready(out)
    assert out.shape == (B, out_dim)
    assert out.dtype == x.dtype

    xf = x.reshape(B, -1)
    # Tight check: same bf16 matmul operands / f32 accumulation as the kernel.
    ref_bf16 = lax.dot_general(
        xf.astype(jnp.bfloat16), weight.astype(jnp.bfloat16),
        dimension_numbers=(((1,), (1,)), ((), ())),
        preferred_element_type=jnp.float32) + bias
    assert jnp.allclose(out, ref_bf16, atol=1e-3, rtol=1e-3)
    # Loose check vs full-f32 PyTorch semantics (bf16 operand rounding only).
    ref_f32 = xf @ weight.T + bias
    assert jnp.allclose(out, ref_f32, atol=3e-2, rtol=3e-2)

    # Second shape: non-tile-aligned batch exercising the multi-step grid
    # (v7x megacore path) and the ragged last block (no wrapper-side padding).
    B2 = 37
    x2 = jax.random.normal(kx2, (B2, C, H, W), dtype=jnp.float32)
    out2 = jax.block_until_ready(logistic_regression_forward(x2, weight, bias))
    assert out2.shape == (B2, out_dim)
    ref2 = x2.reshape(B2, -1) @ weight.T + bias
    assert jnp.allclose(out2, ref2, atol=3e-2, rtol=3e-2)

    print("KERNEL_OK")
</pallas_src>

<mosaic_0001>
module attributes {stable_mosaic.version = 11 : i64} {
  func.func @_linear_kernel(%arg0: i32, %arg1: memref<8x256xf32, #tpu.memory_space<vmem>>, %arg2: memref<256x128xbf16, #tpu.memory_space<vmem>>, %arg3: memref<1x128xf32, #tpu.memory_space<vmem>>, %arg4: memref<8x128xf32, #tpu.memory_space<vmem>>) attributes {dimension_semantics = [#tpu.dimension_semantics<parallel>], iteration_bounds = array<i64: 1>, scalar_prefetch = 0 : i64, scratch_operands = 0 : i64, tpu.core_type = #tpu.core_type<tc>, window_params = [{transform_indices = @transform_0, window_bounds = array<i64: 8, 256>}, {pipeline_mode = #tpu.pipeline_mode<synchronous>, transform_indices = @transform_1, window_bounds = array<i64: 256, 128>}, {pipeline_mode = #tpu.pipeline_mode<synchronous>, transform_indices = @transform_2, window_bounds = array<i64: 1, 128>}, {transform_indices = @transform_3, window_bounds = array<i64: 8, 128>}]} {
    %c0 = arith.constant 0 : index
    %c0_0 = arith.constant 0 : index
    %0 = vector.load %arg1[%c0, %c0_0] : memref<8x256xf32, #tpu.memory_space<vmem>>, vector<8x256xf32>
    %1 = arith.truncf %0 : vector<8x256xf32> to vector<8x256xbf16>
    %c0_1 = arith.constant 0 : index
    %c0_2 = arith.constant 0 : index
    %2 = vector.load %arg2[%c0_1, %c0_2] : memref<256x128xbf16, #tpu.memory_space<vmem>>, vector<256x128xbf16>
    %cst = arith.constant dense<0.000000e+00> : vector<8x128xf32>
    %3 = tpu.matmul %1, %2, %cst {dimension_numbers = #tpu.dot_dimension_numbers<[1], [0], [0], [1], [0, 0, 1, 1], [], []>} : vector<8x256xbf16>, vector<256x128xbf16>, vector<8x128xf32> -> vector<8x128xf32>
    %c0_3 = arith.constant 0 : index
    %c0_4 = arith.constant 0 : index
    %4 = vector.load %arg3[%c0_3, %c0_4] : memref<1x128xf32, #tpu.memory_space<vmem>>, vector<1x128xf32>
    %5 = vector.broadcast %4 : vector<1x128xf32> to vector<8x128xf32>
    %6 = arith.addf %3, %5 : vector<8x128xf32>
    %c0_5 = arith.constant 0 : index
    %c0_6 = arith.constant 0 : index
    %7 = vector.load %arg4[%c0_5, %c0_6] : memref<8x128xf32, #tpu.memory_space<vmem>>, vector<8x128xf32>
    tpu.vector_store %arg4[%c0_5, %c0_6], %6 {strides = array<i32>} : memref<8x128xf32, #tpu.memory_space<vmem>>, vector<8x128xf32>,
    return
  }
  func.func @transform_0(%arg0: i32) -> (i32, i32) {
    %c0_i32 = arith.constant 0 : i32
    %c0_i32_0 = arith.constant 0 : i32
    return %arg0, %c0_i32 : i32, i32
  }
  func.func @transform_1(%arg0: i32) -> (i32, i32) {
    %c0_i32 = arith.constant 0 : i32
    %c0_i32_0 = arith.constant 0 : i32
    %c0_i32_1 = arith.constant 0 : i32
    return %c0_i32, %c0_i32_0 : i32, i32
  }
  func.func @transform_2(%arg0: i32) -> (i32, i32) {
    %c0_i32 = arith.constant 0 : i32
    %c0_i32_0 = arith.constant 0 : i32
    %c0_i32_1 = arith.constant 0 : i32
    return %c0_i32, %c0_i32_0 : i32, i32
  }
  func.func @transform_3(%arg0: i32) -> (i32, i32) {
    %c0_i32 = arith.constant 0 : i32
    %c0_i32_0 = arith.constant 0 : i32
    return %arg0, %c0_i32 : i32, i32
  }
}

</mosaic_0001>

<bundles_post_ra>
// kernel: tpu_custom_call.1
= control target key start
LH: loop header
LB: loop body
LE: loop exit
PB: predicated region body
PF: predicated region fallthrough
CT: control target
= control target key end

     0   :  { %8 = vsyncpa [#allocation3], 0  ;;  %s427_s0 = inlined_call_operand.hbm [shape: f32[8,256], index: 0, kind: input, shape index: {}]   ;;  %s428_s1 = inlined_call_operand.hbm [shape: bf16[256,128], index: 1, kind: input, shape index: {}]   ;;  %s429_s2 = inlined_call_operand.vmem [shape: f32[1,128], index: 2, kind: input, shape index: {}]   ;;  %s430_s3 = inlined_call_operand.hbm [shape: f32[8,128], index: 3, kind: output, shape index: {}]  }
   0x1   :  { %9 = vsyncpa [#allocation6], 0 }
   0x2   :  { %10 = vsyncpa [#allocation4], 0  ;;  %s16_s14 = sshll.u32 %s427_s0, 4  ;;  %s390_s15 = smov [#allocation2]   ;;  %s17_s14 = int_to_ptr.hbm [resolvable:$true] %s16_s14 }
   0x3   :  { %s18_s16 = sshll.u32 %s390_s15, 4  ;;  %s26_s19 = sshll.u32 %s428_s1, 4  ;;  %s19_s16 = int_to_ptr.vmem [resolvable:$true] %s18_s16  ;;  %s27_s19 = int_to_ptr.hbm [resolvable:$true] %s26_s19 }
   0x4   :  { %21 = dma.hbm_to_vmem [thread:$0]  %s17_s14, 256, %s19_s16, [#allocation3]  }
   0x5   :  { %s391_s20 = smov [#allocation5]   ;;  %s392_s22 = smov 64  }
   0x6   :  { %s28_s21 = sshll.u32 %s391_s20, 4  ;;  %s393_s23 = smov 4   ;;  %s29_s21 = int_to_ptr.vmem [resolvable:$true] %s28_s21 }
   0x7   :  { %34 = dma.hbm_to_vmem [thread:$0]  %s27_s19, 2048, %s29_s21, [#allocation6], %s392_s22, %s392_s22, %s393_s23  }
   0x8   :  { %384 = dma.done.wait [#allocation3], 256  }
   0x9   :  { %385 = vsyncadd [#allocation3], 4294967040 }
   0xa   :  { %386 = dma.done.wait [#allocation6], 2048  }
   0xb   :  { %387 = vsyncadd [#allocation6], 4294965248  ;;  %v297_v0 = vld [vmem:[#allocation5 + $0x38] sm:$0xff]  ;;  %v296_v2 = vld [vmem:[#allocation5 + $0x30] sm:$0xff]  ;;  %s394_s24 = smov [#allocation7]   ;;  %s215_s28 = sshll.u32 %s430_s3, 4  ;;  %s216_s28 = int_to_ptr.hbm [resolvable:$true] %s215_s28 }
   0xc   :  { %v305_v1 = vld [vmem:[#allocation5 + $0x78] sm:$0xff]  ;;  %181 = vmatpush.bf16.msra.mxu0 %v297_v0  ;;  %v304_v3 = vld [vmem:[#allocation5 + $0x70] sm:$0xff]  ;;  %v295_v4 = vld [vmem:[#allocation5 + $0x28] sm:$0xff]  ;;  %s213_s25 = sshll.u32 %s394_s24, 4  ;;  %s214_s25 = int_to_ptr.vmem [resolvable:$true] %s213_s25 }
   0xd   :  { %194 = vmatpush.bf16.msra.mxu1 %v305_v1  ;;  %v303_v5 = vld [vmem:[#allocation5 + $0x68] sm:$0xff]  ;;  %v294_v6 = vld [vmem:[#allocation5 + $0x20] sm:$0xff]  ;;  %v293_v8 = vld [vmem:[#allocation5 + $0x18] sm:$0xff] }
   0xe   :  { %v302_v7 = vld [vmem:[#allocation5 + $0x60] sm:$0xff]  ;;  %v301_v9 = vld [vmem:[#allocation5 + $0x58] sm:$0xff]  ;;  %v292_v10 = vld [vmem:[#allocation5 + $0x10] sm:$0xff] }
   0xf   :  { %v300_v11 = vld [vmem:[#allocation5 + $0x50] sm:$0xff]  ;;  %v291_v12 = vld [vmem:[#allocation5 + $0x8] sm:$0xff]  ;;  %v290_v14 = vld [vmem:[#allocation5] sm:$0xff] }
  0x10   :  { %182 = vmatpush.bf16.msra.mxu0 %v296_v2  ;;  %v299_v13 = vld [vmem:[#allocation5 + $0x48] sm:$0xff]  ;;  %v298_v15 = vld [vmem:[#allocation5 + $0x40] sm:$0xff]  ;;  %v45_v16 = vld [vmem:[#allocation2] sm:$0xff] }
  0x11   :  { %195 = vmatpush.bf16.msra.mxu1 %v304_v3  ;;  %v46_v17 = vld [vmem:[#allocation2 + $0x8] sm:$0xff]  ;;  %v47_v18 = vpack.c.bf16 %v45_v16, %v45_v16  ;;  %v311_v20 = vld [vmem:[%s429_s2] ss:$0 sm:$0xff] }
  0x12   :  { %v48_v19 = vpack.c.bf16 %v46_v17, %v46_v17 }
  0x14   :  { %183 = vmatpush.bf16.msra.mxu0 %v295_v4 }
  0x15   :  { %196 = vmatpush.bf16.msra.mxu1 %v303_v5 }
  0x18   :  { %184 = vmatpush.bf16.msra.mxu0 %v294_v6 }
  0x19   :  { %197 = vmatpush.bf16.msra.mxu1 %v302_v7 }
  0x1c   :  { %185 = vmatpush.bf16.msra.mxu0 %v293_v8 }
  0x1d   :  { %198 = vmatpush.bf16.msra.mxu1 %v301_v9 }
  0x20   :  { %186 = vmatpush.bf16.msra.mxu0 %v292_v10 }
  0x21   :  { %199 = vmatpush.bf16.msra.mxu1 %v300_v11 }
  0x24   :  { %187 = vmatpush.bf16.msra.mxu0 %v291_v12 }
  0x25   :  { %200 = vmatpush.bf16.msra.mxu1 %v299_v13 }
  0x28   :  { %188 = vmatpush.bf16.msra.mxu0 %v290_v14 }
  0x29   :  { %201 = vmatpush.bf16.msra.mxu1 %v298_v15 }
  0x2b   :  { %189 = vmatmul.bf16.vlgmr.msra.gmra.mxu0 %v47_v18 }
  0x2c   :  { %202 = vmatmul.bf16.vlgmr.msra.gmra.mxu1 %v48_v19 }
  0xa8   :  { %v190_v21 = vpop.f32.mrf.mxu0 }
  0xa9   :  { %v203_v22 = vpop.f32.mrf.mxu1  ;;  %v191_v23 = vadd.f32 %v311_v20, %v190_v21 }
  0xab   :  { %v204_v24 = vadd.f32 %v203_v22, %v191_v23 }
  0xad   :  { %207 = vst [vmem:[#allocation7] sm:$0xff] %v204_v24 }
  0xae   :  { %218 = dma.vmem_to_hbm [thread:$0]  %s214_s25, 128, %s216_s28, [#allocation4]  }
  0xb0   :  { %v192_v25 = vpop.f32.mrf.mxu0 }
  0xb1   :  { %v205_v26 = vpop.f32.mrf.mxu1 }
  0xb2   :  { %388 = dma.done.wait [#allocation4], 128  }
  0xb3   :  { %389 = vsyncadd [#allocation4], 4294967168 }
  0xb4   :  { %223 = vsyncpa [#allocation3], 1 }
  0xb5   :  { %224 = vsyncpa [#allocation6], 1 }
  0xb6   :  { %225 = vsyncpa [#allocation4], 1 }

</bundles_post_ra>
